<compile_context>
chip_gen: v7x
topology: tpu7x:2x2x1
jax: 0.10.0
libtpu: 0.0.40
codegen_flags: <defaults>
</compile_context>

<pallas_src>
import math
import functools

import jax
import jax.numpy as jnp
from jax import lax
from jax.experimental import pallas as pl
from jax.experimental.pallas import tpu as pltpu


def _round_up(x: int, m: int) -> int:
    return ((x + m - 1) // m) * m


def _sublane_pack(dtype) -> int:
    """Rows per fully-packed vreg sublane group: 8 f32, 16 bf16, 32 int8/fp8."""
    itemsize = jnp.dtype(dtype).itemsize
    return max(8, 32 // max(itemsize, 1))


def _layernorm2d_kernel(x_ref, w_ref, b_ref, o_ref, *, eps: float, inv_h: float):
    """One (tm, H) row-block: full LayerNorm + affine, fused in a single pass."""
    # Pass 1: per-row statistics (f32 accumulation).
    x = x_ref[...].astype(jnp.float32)                          # (tm, H)
    mean = jnp.sum(x, axis=-1, keepdims=True) * inv_h           # E[x]
    mean_sq = jnp.sum(x * x, axis=-1, keepdims=True) * inv_h    # E[x^2]
    # NOTE: E[x^2] - E[x]^2 matches the torch reference exactly; it is
    # cancellation-prone for |mean| >> std but kept for bit-level parity.
    var = mean_sq - mean * mean
    inv_std = lax.rsqrt(var + eps)                              # EUP rsqrt

    # Pass 2 (epilogue): re-read the VMEM-resident tile instead of holding a
    # (tm, H) f32 temporary alive across the whole body (VMEM saver on v7x
    # for sub-32-bit inputs; CSE'd away for f32).
    x2 = x_ref[...].astype(jnp.float32)
    w = w_ref[...].astype(jnp.float32)                          # (1, H) broadcast
    b = b_ref[...].astype(jnp.float32)                          # (1, H)
    o_ref[...] = (b + w * ((x2 - mean) * inv_std)).astype(o_ref.dtype)


def _pick_block_rows(M: int, H: int, dtype, *, target_bytes: int = 2 << 20) -> int:
    """Row-tile from a byte budget, sublane-packed, >=2 grid blocks when possible."""
    pack = _sublane_pack(dtype)
    if M <= pack:
        return M                                   # single full-extent block
    itemsize = jnp.dtype(dtype).itemsize
    tm = max(pack, (target_bytes // max(H * itemsize, 1)) // pack * pack)
    tm = min(tm, _round_up(M, pack))               # never bigger than the row extent
    # v7x megacore: make sure the "parallel" grid axis has >= 2 blocks so both
    # TensorCores get work (no-op on single-TC v5e/v6e).
    while tm > pack and pl.cdiv(M, tm) < 2:
        tm = max(pack, _round_up(tm // 2, pack))
    return tm


def layernorm2d_forward(x, weight, bias, *, eps: float = 1e-5):
    """x: (..., H), weight: (H,), bias: (H,) -> (..., H).

    Single-device (summa_dim == 1) LayerNorm2D forward.
    """
    *lead, H = x.shape
    M = int(math.prod(lead)) if lead else 1
    x2d = x.reshape(M, H)
    w2d = weight.reshape(1, H)
    b2d = bias.reshape(1, H)
    # TODO(synk): if production H is not lane-dense (multiple of 128), pad the
    # hidden dim of x/weight/bias/out once outside the hot loop rather than
    # shrinking the lane dimension; H is the full array dim here so the
    # BlockSpec is still legal either way.

    tm = _pick_block_rows(M, H, x.dtype)
    grid = (pl.cdiv(M, tm),)

    x_itemsize = jnp.dtype(x.dtype).itemsize
    w_itemsize = jnp.dtype(weight.dtype).itemsize

    # Double-buffered x + out blocks, resident params, a few f32 intermediates.
    working_set = (
        2 * tm * H * x_itemsize      # x blocks (2-deep pipeline)
        + 2 * tm * H * x_itemsize    # out blocks (2-deep pipeline)
        + 3 * tm * H * 4             # f32 intermediates (conservative)
        + 2 * 2 * H * w_itemsize     # weight / bias blocks
    )
    # Headroom, but stay well inside v7x's 64 MiB physical VMEM.
    vmem_limit = int(min(max(working_set * 3 // 2, 16 << 20), 48 << 20))

    out = pl.pallas_call(
        functools.partial(_layernorm2d_kernel, eps=eps, inv_h=1.0 / float(H)),
        out_shape=jax.ShapeDtypeStruct((M, H), x.dtype),
        grid_spec=pltpu.PrefetchScalarGridSpec(
            num_scalar_prefetch=0,
            grid=grid,
            in_specs=[
                pl.BlockSpec((tm, H), lambda i: (i, 0)),   # x row block
                pl.BlockSpec((1, H), lambda i: (0, 0)),    # weight (resident)
                pl.BlockSpec((1, H), lambda i: (0, 0)),    # bias   (resident)
            ],
            out_specs=pl.BlockSpec((tm, H), lambda i: (i, 0)),
        ),
        compiler_params=pltpu.CompilerParams(
            dimension_semantics=("parallel",),
            vmem_limit_bytes=vmem_limit,
        ),
        cost_estimate=pl.CostEstimate(
            flops=8 * M * H,
            transcendentals=M,
            bytes_accessed=2 * M * H * x_itemsize + 2 * H * w_itemsize,
        ),
    )(x2d, w2d, b2d)

    return out.reshape(*lead, H)


def init_params(normalized_shape: int, dtype=jnp.float32):
    """Mirror LayerNorm2D reset state on one device (summa_dim = 1):
    weight = ones(H), bias = zeros(H)."""
    return jnp.ones((normalized_shape,), dtype), jnp.zeros((normalized_shape,), dtype)


if __name__ == "__main__":
    key = jax.random.PRNGKey(0)
    kx, kw, kb = jax.random.split(key, 3)

    batch, seq, hidden = 2, 8, 256      # hidden = normalized_shape (lane-dense)
    eps = 1e-5

    x = jax.random.normal(kx, (batch, seq, hidden), jnp.float32)
    # module init is ones/zeros; use random affine params to exercise the math
    weight = 1.0 + 0.1 * jax.random.normal(kw, (hidden,), jnp.float32)
    bias = 0.1 * jax.random.normal(kb, (hidden,), jnp.float32)

    out = layernorm2d_forward(x, weight, bias, eps=eps)
    out = jax.block_until_ready(out)

    # Pure-JAX reference matching the torch module's math exactly.
    mean = jnp.mean(x, axis=-1, keepdims=True)
    var = jnp.mean(x * x, axis=-1, keepdims=True) - mean * mean
    ref = bias + weight * (x - mean) * (1.0 / jnp.sqrt(var + eps))

    assert out.shape == (batch, seq, hidden)
    assert jnp.allclose(out, ref, atol=1e-4, rtol=1e-4)

    # Also exercise a non-divisible row count (partial edge block, masked
    # writes) to validate the pad-free pl.cdiv grid path.
    x_odd = jax.random.normal(kx, (3, 7, hidden), jnp.float32)
    out_odd = jax.block_until_ready(layernorm2d_forward(x_odd, weight, bias, eps=eps))
    mean_o = jnp.mean(x_odd, axis=-1, keepdims=True)
    var_o = jnp.mean(x_odd * x_odd, axis=-1, keepdims=True) - mean_o * mean_o
    ref_o = bias + weight * (x_odd - mean_o) * (1.0 / jnp.sqrt(var_o + eps))
    assert jnp.allclose(out_odd, ref_o, atol=1e-4, rtol=1e-4)
    assert bool(jnp.all(jnp.isfinite(out_odd)))

    print("KERNEL_OK")
</pallas_src>

<mosaic_0001>
module attributes {stable_mosaic.version = 11 : i64} {
  func.func @_layernorm2d_kernel(%arg0: i32, %arg1: memref<8x256xf32, #tpu.memory_space<vmem>>, %arg2: memref<1x256xf32, #tpu.memory_space<vmem>>, %arg3: memref<1x256xf32, #tpu.memory_space<vmem>>, %arg4: memref<8x256xf32, #tpu.memory_space<vmem>>) attributes {dimension_semantics = [#tpu.dimension_semantics<parallel>], iteration_bounds = array<i64: 2>, scalar_prefetch = 0 : i64, scratch_operands = 0 : i64, tpu.core_type = #tpu.core_type<tc>, window_params = [{transform_indices = @transform_0, window_bounds = array<i64: 8, 256>}, {pipeline_mode = #tpu.pipeline_mode<synchronous>, transform_indices = @transform_1, window_bounds = array<i64: 1, 256>}, {pipeline_mode = #tpu.pipeline_mode<synchronous>, transform_indices = @transform_2, window_bounds = array<i64: 1, 256>}, {transform_indices = @transform_3, window_bounds = array<i64: 8, 256>}]} {
    %c0 = arith.constant 0 : index
    %c0_0 = arith.constant 0 : index
    %0 = vector.load %arg1[%c0, %c0_0] : memref<8x256xf32, #tpu.memory_space<vmem>>, vector<8x256xf32>
    %cst = arith.constant dense<0.000000e+00> : vector<8xf32>
    %1 = vector.multi_reduction <add>, %0, %cst [1] : vector<8x256xf32> to vector<8xf32>
    %2 = vector.shape_cast %1 : vector<8xf32> to vector<8x1xf32>
    %cst_1 = arith.constant 3.906250e-03 : f32
    %3 = vector.broadcast %cst_1 : f32 to vector<8x1xf32>
    %4 = arith.mulf %2, %3 : vector<8x1xf32>
    %5 = arith.mulf %0, %0 : vector<8x256xf32>
    %cst_2 = arith.constant dense<0.000000e+00> : vector<8xf32>
    %6 = vector.multi_reduction <add>, %5, %cst_2 [1] : vector<8x256xf32> to vector<8xf32>
    %7 = vector.shape_cast %6 : vector<8xf32> to vector<8x1xf32>
    %cst_3 = arith.constant 3.906250e-03 : f32
    %8 = vector.broadcast %cst_3 : f32 to vector<8x1xf32>
    %9 = arith.mulf %7, %8 : vector<8x1xf32>
    %10 = arith.mulf %4, %4 : vector<8x1xf32>
    %11 = arith.subf %9, %10 : vector<8x1xf32>
    %cst_4 = arith.constant 9.99999974E-6 : f32
    %12 = vector.broadcast %cst_4 : f32 to vector<8x1xf32>
    %13 = arith.addf %11, %12 : vector<8x1xf32>
    %14 = math.rsqrt %13 : vector<8x1xf32>
    %c0_5 = arith.constant 0 : index
    %c0_6 = arith.constant 0 : index
    %15 = vector.load %arg1[%c0_5, %c0_6] : memref<8x256xf32, #tpu.memory_space<vmem>>, vector<8x256xf32>
    %c0_7 = arith.constant 0 : index
    %c0_8 = arith.constant 0 : index
    %16 = vector.load %arg2[%c0_7, %c0_8] : memref<1x256xf32, #tpu.memory_space<vmem>>, vector<1x256xf32>
    %c0_9 = arith.constant 0 : index
    %c0_10 = arith.constant 0 : index
    %17 = vector.load %arg3[%c0_9, %c0_10] : memref<1x256xf32, #tpu.memory_space<vmem>>, vector<1x256xf32>
    %18 = vector.broadcast %4 : vector<8x1xf32> to vector<8x256xf32>
    %19 = arith.subf %15, %18 : vector<8x256xf32>
    %20 = vector.broadcast %14 : vector<8x1xf32> to vector<8x256xf32>
    %21 = arith.mulf %19, %20 : vector<8x256xf32>
    %22 = vector.broadcast %16 : vector<1x256xf32> to vector<8x256xf32>
    %23 = arith.mulf %22, %21 : vector<8x256xf32>
    %24 = vector.broadcast %17 : vector<1x256xf32> to vector<8x256xf32>
    %25 = arith.addf %24, %23 : vector<8x256xf32>
    %c0_11 = arith.constant 0 : index
    %c0_12 = arith.constant 0 : index
    %26 = vector.load %arg4[%c0_11, %c0_12] : memref<8x256xf32, #tpu.memory_space<vmem>>, vector<8x256xf32>
    tpu.vector_store %arg4[%c0_11, %c0_12], %25 {strides = array<i32>} : memref<8x256xf32, #tpu.memory_space<vmem>>, vector<8x256xf32>,
    return
  }
  func.func @transform_0(%arg0: i32) -> (i32, i32) {
    %c0_i32 = arith.constant 0 : i32
    %c0_i32_0 = arith.constant 0 : i32
    return %arg0, %c0_i32 : i32, i32
  }
  func.func @transform_1(%arg0: i32) -> (i32, i32) {
    %c0_i32 = arith.constant 0 : i32
    %c0_i32_0 = arith.constant 0 : i32
    %c0_i32_1 = arith.constant 0 : i32
    return %c0_i32, %c0_i32_0 : i32, i32
  }
  func.func @transform_2(%arg0: i32) -> (i32, i32) {
    %c0_i32 = arith.constant 0 : i32
    %c0_i32_0 = arith.constant 0 : i32
    %c0_i32_1 = arith.constant 0 : i32
    return %c0_i32, %c0_i32_0 : i32, i32
  }
  func.func @transform_3(%arg0: i32) -> (i32, i32) {
    %c0_i32 = arith.constant 0 : i32
    %c0_i32_0 = arith.constant 0 : i32
    return %arg0, %c0_i32 : i32, i32
  }
}

</mosaic_0001>

<bundles_post_ra>
// kernel: tpu_custom_call.1
= control target key start
LH: loop header
LB: loop body
LE: loop exit
PB: predicated region body
PF: predicated region fallthrough
CT: control target
= control target key end

     0   :  { %8 = vsyncpa [#allocation3], 0  ;;  %s677_s0 = inlined_call_operand.hbm [shape: f32[16,256], index: 0, kind: input, shape index: {}]   ;;  %s678_s1 = inlined_call_operand.vmem [shape: f32[1,256], index: 1, kind: input, shape index: {}]   ;;  %s679_s2 = inlined_call_operand.vmem [shape: f32[1,256], index: 2, kind: input, shape index: {}]   ;;  %s680_s3 = inlined_call_operand.hbm [shape: f32[16,256], index: 3, kind: output, shape index: {}]  }
   0x1   :  { %10 = vsyncpa [#allocation3 + $0x1], 0 }
   0x2   :  { %11 = vsyncpa [#allocation4], 0 }
   0x3   :  { %13 = vsyncpa [#allocation4 + $0x1], 0  ;;  %s506_s12 = smov 0   ;;  %s508_s13 = smov 0  }
   0x4   :  { %s510_s14 = smov 0   ;;  %s512_s15 = smov 0  }
   0x5 LB: > { %s527_s16 = sadd.s32 4294967295, %s482_s15   ;;  %s322_s17 = sadd.s32 4294967294, %s482_s15   ;;  %s482_s15 = sphi %s512_s15, %s695_s15   ;;  %s478_s14 = sphi %s510_s14, %s694_s14   ;;  %s474_s13 = sphi %s508_s13, %s693_s13   ;;  %s470_s12 = sphi %s506_s12, %s692_s12  }
   0x6   : > { %s531_s18 = sadd.s32 1, %s482_s15   ;;  %s26_s19 = sadd.s32 1, %s478_s14 }
   0x7   : > { %s23_s20 = ssub.s32 %s482_s15, %s531_s18  ;;  %p33_p0 = scmp.ne.s32.totalorder %s478_s14, %s474_s13 }
   0x8   : > { %p24_p1 = scmp.eq.s32.totalorder %s23_s20, 0  ;;  %p34_p2 = scmp.eq.s32.totalorder %s482_s15, 0 }
   0x9   : > { %p39_p3 = scmp.ne.s32.totalorder %s474_s13, %s470_s12  ;;  %p40_p4 = scmp.eq.s32.totalorder %s527_s16, 0 }
   0xa   : > { %s543_s21 = scalar_select %p24_p1, %s478_s14, %s26_s19  }
   0xb   : > { %p545_p5 = por %p34_p2, %p33_p0  ;;  %p549_p6 = por %p40_p4, %p39_p3 }
   0xc   : > { %p105_p7 = scmp.eq.s32.totalorder %s527_s16, 1  ;;  %p111_p8 = scmp.eq.s32.totalorder %s322_s17, 1 }
   0xd   : > { %p350_p10 = scmp.lt.s32.totalorder %s482_s15, 2  ;;  %s137_s26 = sand.u32 1, %s478_s14  }
   0xe   : > { %p556_p11 = por %p105_p7, %p33_p0  ;;  %p560_p12 = por %p111_p8, %p39_p3 }
   0xf   : > { %s336_s27 = sshll.u32 %s482_s15, 8  ;;  %s325_s28 = sshll.u32 %s137_s26, 4 }
  0x10   : > { %s684_s24 = scalar_select %p556_p11, 1, 0 }
  0x11   : > { %s685_s25 = scalar_select %p560_p12, 1, 0 }
  0x12   : > { %s569_s4 = scalar_lea.hbm %s677_s0, %s336_s27  ;;  %s141_s5 = scalar_lea.vmem [#allocation2], %s325_s28 }
  0x13   : > { %s149_s6 = sshll.u32 %s141_s5, 4  ;;  %p573_p13 = pnand %p350_p10, %p545_p5  ;;  %s577_s6 = int_to_ptr.vmem [resolvable:$true] %s149_s6 }
  0x14   : > { %s138_s8 = scalar_lea.sflag [#allocation3], %s137_s26  ;;  %s386_s9 = scalar_lea.hbm %s569_s4, 256 }
  0x15   : > { %p387_p2 = scmp.ne.s32.totalorder %s569_s4, %s386_s9  ;;  %p388_p3 = pneg %p573_p13 }
  0x16   : > { %s391_s17 = scalar_lea.hbm %s677_s0, 512  ;;  %p392_p5 = scmp.lt.u32.totalorder %s569_s4, %s677_s0 }
  0x17   : > { %p389_p4 = pnand %p388_p3, %p387_p2  ;;  %p393_p8 = scmp.lt.u32.totalorder %s391_s17, %s386_s9 }
  0x18   : > { %p395_p9 = scmp.lt.u32.totalorder %s386_s9, %s569_s4 }
  0x19   : > { %p390_p7 = pneg %p389_p4  ;;  %p394_p10 = por %p393_p8, %p392_p5 }
  0x1b   : > { %p396_p0 = por %p395_p9, %p394_p10 }
  0x1d   : > { %p397_p1 = pnand %p396_p0, %p390_p7 }
  0x1f   : > { %400 = shalt.err (!%p397_p1)
}
  0x20   : > { %s401_s22 = scalar_lea.vmem %s577_s6, 256  ;;  %s484_s26 = smov [#allocation2]  }
  0x21   : > { %p402_p2 = scmp.ne.s32.totalorder %s577_s6, %s401_s22  ;;  %s406_s27 = sshll.u32 %s484_s26, 4  ;;  %s407_s27 = int_to_ptr.vmem [resolvable:$false] %s406_s27 }
  0x22   : > { %s408_s28 = scalar_lea.vmem %s407_s27, 512  ;;  %p409_p11 = scmp.lt.s32.totalorder %s577_s6, %s407_s27 }
  0x23   : > { %p404_p4 = pnand %p402_p2, %p388_p3  ;;  %p410_p5 = scmp.lt.s32.totalorder %s408_s28, %s401_s22 }
  0x25   : > { %p405_p12 = pneg %p404_p4  ;;  %p411_p8 = por %p410_p5, %p409_p11 }
  0x27   : > { %p412_p9 = pnand %p411_p8, %p405_p12 }
  0x29   : > { %415 = shalt.err (!%p412_p9)
}
  0x2a   : > { %345 = dma.hbm_to_vmem [thread:$0]  (!%p573_p13), %s569_s4, 256, %s577_s6, %s138_s8  }
  0x2b   : > { %p687_p0 = scmp.lt.s32.totalorder %s482_s15, 3  ;;  %p688_p1 = scmp.ge.s32.totalorder %s482_s15, 1 }
  0x2d   : > { %p155_p3 = pnand %p688_p1, %p687_p0 }
  0x2e   : > { %s611_s29 = sand.u32 (!%p155_p3), 1, %s474_s13  }
  0x2f   : > { %158 = sbr.rel (%p155_p3) target bundleno = 241 (0xf1), region = 32  ;;  %s329_s30 = sshll.u32 (!%p155_p3), %s611_s29, 4 }
  0x30   : > { %s161_s5 = scalar_lea.sflag (!%p155_p3), [#allocation3], %s611_s29  ;;  %s164_s7 = scalar_lea.vmem (!%p155_p3), [#allocation2], %s329_s30 }
  0x36   : > { %461 = dma.done.wait (%p549_p6), %s161_s5, 256  }
  0x37   : > { %463 = vsyncadd (%p549_p6), %s161_s5, 4294967040  ;;  %v187_v0 = vld [vmem:[%s164_s7] sm:$0xff]  ;;  %v188_v1 = vld [vmem:[%s164_s7 + $0x8] sm:$0xff]  ;;  %v210_v12 = vlaneseq  ;;  %s337_s9 = sshll.u32 %s527_s16, 8  ;;  %s186_s10 = scalar_lea.vmem [#allocation5], %s329_s30 }
  0x38   : > { %v189_v2 = vadd.f32 %v188_v1, %v187_v0  ;;  %v193_v3 = vmul.f32 %v187_v0, %v187_v0  ;;  %v194_v4 = vmul.f32 %v188_v1, %v188_v1  ;;  %v203_v17 = vld [vmem:[%s678_s1] sm:$0x3]  ;;  %s252_s11 = sshll.u32 %s186_s10, 4  ;;  %s633_s20 = scalar_lea.hbm %s680_s3, %s337_s9  ;;  %s635_s11 = int_to_ptr.vmem [resolvable:$true] %s252_s11 }
  0x39   : > { %v211_v14 = vshrl.u32 %v210_v12, 7  ;;  %v204_v18 = vld [vmem:[%s679_s2] sm:$0x3]  ;;  %s238_s16 = scalar_lea.sflag [#allocation4], %s611_s29  ;;  %s416_s22 = scalar_lea.vmem %s635_s11, 256 }
  0x3a   : > { %190 = vadd.xlane.f32.xlu0 %v189_v2  ;;  %v195_v5 = vadd.f32 %v194_v4, %v193_v3  ;;  %p417_p6 = scmp.ne.s32.totalorder %s635_s11, %s416_s22  ;;  %p689_p11 = scmp.ne.s32.totalorder %s684_s24, 0 }
  0x3b   : > { %v212_v15 = vsub.s32 0, %v211_v14  ;;  %v216_v16 = vsub.s32 1, %v211_v14  ;;  %s485_s26 = smov [#allocation5]  }
  0x3c   : > { %p418_p12 = pnand %p417_p6, %p689_p11  ;;  %s420_s27 = sshll.u32 %s485_s26, 4  ;;  %s421_s27 = int_to_ptr.vmem [resolvable:$false] %s420_s27 }
  0x3d   : > { %v213_v21 = vrot.slane %v203_v17, %v212_v15  ;;  %v217_v22 = vrot.slane %v203_v17, %v216_v16  ;;  %v226_v26 = vrot.slane %v204_v18, %v212_v15  ;;  %v230_v27 = vrot.slane %v204_v18, %v216_v16  ;;  %s422_s28 = scalar_lea.vmem %s421_s27, 512  ;;  %p423_p7 = scmp.lt.s32.totalorder %s635_s11, %s421_s27 }
  0x3e   : > { %196 = vadd.xlane.f32.xlu0 %v195_v5  ;;  %p419_p13 = pneg %p418_p12  ;;  %p424_p10 = scmp.lt.s32.totalorder %s422_s28, %s416_s22 }
  0x40   : > { %p425_p2 = por %p424_p10, %p423_p7 }
  0x42   : > { %p426_p4 = pnand %p425_p2, %p419_p13 }
  0xc7   : > { %v191_v6 = vpop.xlane.xlu0 %190 }
  0xc8   : > { %v192_v7 = vmul.f32 0.00390625, %v191_v6 }
  0xca   : > { %v199_v9 = vmul.f32 %v192_v7, %v192_v7  ;;  %v205_v19 = vsub.f32 %v187_v0, %v192_v7  ;;  %v206_v20 = vsub.f32 %v188_v1, %v192_v7 }
  0xcb   : > { %v197_v8 = vpop.xlane.xlu0 %196 }
  0xcc   : > { %v198_v10 = vmul.f32 0.00390625, %v197_v8 }
  0xce   : > { %v200_v11 = vsub.f32 %v198_v10, %v199_v9 }
  0xd0   : > { %v201_v13 = vadd.f32 1e-05, %v200_v11 }
  0xd2   : > { %384 = vrsqrt.f32 %v201_v13 }
  0xdc   : > { %v385_v23 = vpop.eup %384 }
  0xdd   : > { %v207_v24 = vmul.f32 %v385_v23, %v205_v19  ;;  %v208_v25 = vmul.f32 %v385_v23, %v206_v20 }
  0xdf   : > { %v220_v28 = vmul.f32 %v213_v21, %v207_v24  ;;  %v221_v29 = vmul.f32 %v217_v22, %v208_v25 }
  0xe1   : > { %v233_v30 = vadd.f32 %v226_v26, %v220_v28  ;;  %v234_v31 = vadd.f32 %v230_v27, %v221_v29 }
  0xe3   : > { %235 = vst [vmem:[%s186_s10] sm:$0xff] %v233_v30  ;;  %236 = vst [vmem:[%s186_s10 + $0x8] sm:$0xff] %v234_v31 }
  0xe4   : > { %429 = shalt.err (!%p426_p4)
}
  0xe5   : > { %s430_s29 = scalar_lea.hbm %s633_s20, 256  ;;  %s434_s7 = scalar_lea.hbm %s680_s3, 512 }
  0xe6   : > { %p431_p5 = scmp.ne.s32.totalorder %s633_s20, %s430_s29  ;;  %p435_p0 = scmp.lt.u32.totalorder %s633_s20, %s680_s3 }
  0xe7   : > { %p436_p1 = scmp.lt.u32.totalorder %s434_s7, %s430_s29  ;;  %p438_p6 = scmp.lt.u32.totalorder %s430_s29, %s633_s20 }
  0xe8   : > { %p432_p8 = pnand %p431_p5, %p689_p11 }
  0xe9   : > { %p437_p3 = por %p436_p1, %p435_p0 }
  0xea   : > { %p433_p9 = pneg %p432_p8 }
  0xeb   : > { %p439_p12 = por %p438_p6, %p437_p3 }
  0xed   : > { %p440_p13 = pnand %p439_p12, %p433_p9 }
  0xef   : > { %443 = shalt.err (!%p440_p13)
}
  0xf0   : > { %340 = dma.vmem_to_hbm [thread:$0]  (%p689_p11), %s635_s11, 256, %s633_s20, %s238_s16  }
  0xf1 PF: > { %s264_s6 = sand.u32 1, %s470_s12   ;;  %p690_p7 = scmp.ne.s32.totalorder %s685_s25, 0 }
  0xf2   : > { %p691_p10 = scmp.ge.s32.totalorder %s482_s15, 2  ;;  %s265_s8 = scalar_lea.sflag [#allocation4], %s264_s6 }
  0xf4   : > { %p347_p2 = pnand %p691_p10, %p690_p7 }
  0xf6   : > { %465 = dma.done.wait (!%p347_p2), %s265_s8, 256  }
  0xf7   : > { %467 = vsyncadd (!%p347_p2), %s265_s8, 4294967040  ;;  %p16_p4 = scmp.ge.s32.totalorder %s531_s18, 4   ;;  %s692_s12 = smov %s474_s13 }
  0xf8   : > { %s693_s13 = smov %s478_s14  ;;  %s694_s14 = smov %s543_s21 }
  0xf9   : > { %s695_s15 = smov %s531_s18  ;;  %18 = sbr.rel (!%p16_p4) target bundleno = 5 (0x5), region = 77 }
 0x100   :  { %270 = vsyncpa [#allocation3], 1 }
 0x101   :  { %272 = vsyncpa [#allocation3 + $0x1], 1 }
 0x102   :  { %273 = vsyncpa [#allocation4], 1 }
 0x103   :  { %275 = vsyncpa [#allocation4 + $0x1], 1 }

</bundles_post_ra>
